<compile_context>
chip_gen: v7x
topology: tpu7x:2x2x1
jax: 0.10.0
libtpu: 0.0.40
codegen_flags: <defaults>
</compile_context>

<pallas_src>
import jax
import jax.numpy as jnp
from jax.experimental import pallas as pl
from jax.experimental.pallas import tpu as pltpu

_LANES = 128
_SUBLANES = 8


def _segment_loss_kernel(coef_ref, l0_ref, l1_ref, out_ref):
    """out = c0 * L0 + c1 * L1 on one lane-dense [block_rows, 128] tile."""
    c0 = coef_ref[0]          # scalars from SMEM
    c1 = coef_ref[1]
    out_ref[...] = c0 * l0_ref[...] + c1 * l1_ref[...]


def _ceil_to(x, m):
    return (x + m - 1) // m * m


def segment_loss(loss_list, w1, w2, *, max_block_rows=2048):
    """JAX/Pallas equivalent of SegmentLoss().forward(loss_list) with weights w1, w2."""
    l0, l1 = loss_list[0], loss_list[1]
    assert l0.shape == l1.shape, (l0.shape, l1.shape)
    orig_shape = l0.shape

    # Scalar coefficient math (1-element params, one log each) is done once in
    # the wrapper; the kernel only sees the two combined coefficients in SMEM.
    w1s = jnp.asarray(w1, jnp.float32).reshape(())
    w2s = jnp.asarray(w2, jnp.float32).reshape(())
    c0 = 1.0 / (2.0 * w1s) + 0.5 * jnp.log(w1s)
    c1 = 0.5 * w2s + jnp.log(1.0 + w2s)
    coefs = jnp.stack([c0, c1])                      # f32[2] -> SMEM

    # Flatten + pad to a lane-dense [rows, 128] layout (multiple of (8, 128)).
    n = 1
    for d in orig_shape:
        n *= int(d)
    n = max(n, 1)
    rows = _ceil_to(pl.cdiv(n, _LANES), _SUBLANES)
    block_rows = min(rows, max_block_rows)           # <= 2 MiB/tile/input, f32
    rows = _ceil_to(rows, block_rows)
    n_padded = rows * _LANES

    def _prep(x):
        x = x.astype(jnp.float32).reshape(-1)
        x = jnp.pad(x, (0, n_padded - n))
        return x.reshape(rows, _LANES)

    a = _prep(l0)
    b = _prep(l1)

    grid = (rows // block_rows,)
    out = pl.pallas_call(
        _segment_loss_kernel,
        out_shape=jax.ShapeDtypeStruct((rows, _LANES), jnp.float32),
        grid_spec=pl.GridSpec(
            grid=grid,
            in_specs=[
                pl.BlockSpec(memory_space=pltpu.MemorySpace.SMEM),   # coefficients
                pl.BlockSpec((block_rows, _LANES), lambda i: (i, 0)),
                pl.BlockSpec((block_rows, _LANES), lambda i: (i, 0)),
            ],
            out_specs=pl.BlockSpec((block_rows, _LANES), lambda i: (i, 0)),
        ),
        compiler_params=pltpu.CompilerParams(
            dimension_semantics=("parallel",)),
    )(coefs, a, b)

    return out.reshape(-1)[:n].reshape(orig_shape)


def segment_loss_ref(loss_list, w1, w2):
    """Pure-JAX reference mirroring the PyTorch forward op-for-op."""
    w1 = jnp.asarray(w1, jnp.float32)
    w2 = jnp.asarray(w2, jnp.float32)
    l0 = loss_list[0].astype(jnp.float32)
    l1 = loss_list[1].astype(jnp.float32)
    factor = 1.0 / (2.0 * w1)
    loss = factor * l0 + 0.5 * jnp.log(w1) * l0
    factor = 0.5 * w2
    loss = loss + (factor * l1 + jnp.log(1.0 + w2) * l1)
    return loss


if __name__ == "__main__":
    key = jax.random.PRNGKey(0)
    k1, k2, k3, k4 = jax.random.split(key, 4)

    # Per-pixel segmentation losses: batch=2, H=16, W=16.
    loss0 = jax.random.uniform(k1, (2, 16, 16), dtype=jnp.float32)
    loss1 = jax.random.uniform(k2, (2, 16, 16), dtype=jnp.float32)

    # Learnable weights, initialized like nn.init.uniform_ in the module.
    # TODO(synk): parameter creation/init is host-side nn.Parameter setup, not
    # kernel work; represented here as plain jax arrays.
    w1 = jax.random.uniform(k3, (1,), minval=0.2, maxval=0.5, dtype=jnp.float32)
    w2 = jax.random.uniform(k4, (1,), minval=0.9, maxval=1.0, dtype=jnp.float32)

    out = segment_loss([loss0, loss1], w1, w2)
    out = jax.block_until_ready(out)

    ref = segment_loss_ref([loss0, loss1], w1, w2)
    assert out.shape == ref.shape, (out.shape, ref.shape)
    assert jnp.allclose(out, ref, rtol=1e-5, atol=1e-6), (out, ref)
    print("KERNEL_OK")
</pallas_src>

<mosaic_0001>
module attributes {stable_mosaic.version = 11 : i64} {
  func.func @_segment_loss_kernel(%arg0: i32, %arg1: memref<2xf32, #tpu.memory_space<smem>>, %arg2: memref<8x128xf32, #tpu.memory_space<vmem>>, %arg3: memref<8x128xf32, #tpu.memory_space<vmem>>, %arg4: memref<8x128xf32, #tpu.memory_space<vmem>>) attributes {dimension_semantics = [#tpu.dimension_semantics<parallel>], iteration_bounds = array<i64: 1>, scalar_prefetch = 0 : i64, scratch_operands = 0 : i64, tpu.core_type = #tpu.core_type<tc>, window_params = [{transform_indices = @transform_0, window_bounds = array<i64: 2>}, {transform_indices = @transform_1, window_bounds = array<i64: 8, 128>}, {transform_indices = @transform_2, window_bounds = array<i64: 8, 128>}, {transform_indices = @transform_3, window_bounds = array<i64: 8, 128>}]} {
    %c0 = arith.constant 0 : index
    %0 = memref.load %arg1[%c0] : memref<2xf32, #tpu.memory_space<smem>>
    %c1 = arith.constant 1 : index
    %1 = memref.load %arg1[%c1] : memref<2xf32, #tpu.memory_space<smem>>
    %c0_0 = arith.constant 0 : index
    %c0_1 = arith.constant 0 : index
    %2 = vector.load %arg2[%c0_0, %c0_1] : memref<8x128xf32, #tpu.memory_space<vmem>>, vector<8x128xf32>
    %3 = vector.broadcast %0 : f32 to vector<8x128xf32>
    %4 = arith.mulf %3, %2 : vector<8x128xf32>
    %c0_2 = arith.constant 0 : index
    %c0_3 = arith.constant 0 : index
    %5 = vector.load %arg3[%c0_2, %c0_3] : memref<8x128xf32, #tpu.memory_space<vmem>>, vector<8x128xf32>
    %6 = vector.broadcast %1 : f32 to vector<8x128xf32>
    %7 = arith.mulf %6, %5 : vector<8x128xf32>
    %8 = arith.addf %4, %7 : vector<8x128xf32>
    %c0_4 = arith.constant 0 : index
    %c0_5 = arith.constant 0 : index
    %9 = vector.load %arg4[%c0_4, %c0_5] : memref<8x128xf32, #tpu.memory_space<vmem>>, vector<8x128xf32>
    tpu.vector_store %arg4[%c0_4, %c0_5], %8 {strides = array<i32>} : memref<8x128xf32, #tpu.memory_space<vmem>>, vector<8x128xf32>,
    return
  }
  func.func @transform_0(%arg0: i32) -> i32 {
    %c0_i32 = arith.constant 0 : i32
    %c0_i32_0 = arith.constant 0 : i32
    return %c0_i32 : i32
  }
  func.func @transform_1(%arg0: i32) -> (i32, i32) {
    %c0_i32 = arith.constant 0 : i32
    %c0_i32_0 = arith.constant 0 : i32
    return %arg0, %c0_i32 : i32, i32
  }
  func.func @transform_2(%arg0: i32) -> (i32, i32) {
    %c0_i32 = arith.constant 0 : i32
    %c0_i32_0 = arith.constant 0 : i32
    return %arg0, %c0_i32 : i32, i32
  }
  func.func @transform_3(%arg0: i32) -> (i32, i32) {
    %c0_i32 = arith.constant 0 : i32
    %c0_i32_0 = arith.constant 0 : i32
    return %arg0, %c0_i32 : i32, i32
  }
}

</mosaic_0001>

<bundles_post_ra>
// kernel: tpu_custom_call.1
= control target key start
LH: loop header
LB: loop body
LE: loop exit
PB: predicated region body
PF: predicated region fallthrough
CT: control target
= control target key end

     0   :  { %8 = vsyncpa [#allocation5], 0  ;;  %s238_s0 = inlined_call_operand.hbm [shape: f32[2], index: 0, kind: input, shape index: {}]   ;;  %s239_s1 = inlined_call_operand.hbm [shape: f32[8,128], index: 1, kind: input, shape index: {}]   ;;  %s240_s2 = inlined_call_operand.hbm [shape: f32[8,128], index: 2, kind: input, shape index: {}]   ;;  %s241_s3 = inlined_call_operand.hbm [shape: f32[8,128], index: 3, kind: output, shape index: {}]  }
   0x1   :  { %9 = vsyncpa [#allocation3], 0 }
   0x2   :  { %10 = vsyncpa [#allocation8], 0 }
   0x3   :  { %11 = vsyncpa [#allocation4], 0  ;;  %s82_s14 = scalar_lea.hbm %s238_s0, 16 }
   0x4   :  { %p83_p0 = scmp.ne.s32.totalorder %s238_s0, %s82_s14  ;;  %p86_p1 = scmp.lt.u32.totalorder %s82_s14, %s238_s0 }
   0x6   :  { %p88_p2 = pnand %p86_p1, %p83_p0 }
   0x8   :  { %91 = shalt.err (!%p88_p2)
}
   0x9   :  { %s166_s19 = smov [#allocation2]   ;;  %s167_s22 = smov [#allocation6]  }
   0xa   :  { %19 = dma.hbm_to_smem %s238_s0, 16, %s166_s19, [#allocation5]  }
   0xb   :  { %s26_s23 = sshll.u32 %s167_s22, 4  ;;  %s168_s24 = smov [#allocation7]   ;;  %s27_s23 = int_to_ptr.vmem [resolvable:$true] %s26_s23 }
   0xc   :  { %s36_s25 = sshll.u32 %s168_s24, 4  ;;  %s92_s28 = scalar_lea.hbm %s239_s1, 128  ;;  %s37_s25 = int_to_ptr.vmem [resolvable:$true] %s36_s25 }
   0xd   :  { %p93_p3 = scmp.ne.s32.totalorder %s239_s1, %s92_s28  ;;  %p96_p4 = scmp.lt.u32.totalorder %s92_s28, %s239_s1 }
   0xf   :  { %p98_p5 = pnand %p96_p4, %p93_p3 }
  0x11   :  { %101 = shalt.err (!%p98_p5)
}
  0x12   :  { %s102_s0 = scalar_lea.vmem %s27_s23, 128  ;;  %p107_p7 = scmp.lt.s32.totalorder %s27_s23, %s27_s23 }
  0x13   :  { %p103_p6 = scmp.ne.s32.totalorder %s27_s23, %s102_s0  ;;  %p108_p8 = scmp.lt.s32.totalorder %s102_s0, %s102_s0 }
  0x15   :  { %p109_p9 = por %p108_p8, %p107_p7 }
  0x17   :  { %p110_p10 = pnand %p109_p9, %p103_p6 }
  0x19   :  { %113 = shalt.err (!%p110_p10)
}
  0x1a   :  { %29 = dma.hbm_to_vmem [thread:$0]  %s239_s1, 128, %s27_s23, [#allocation3]  }
  0x1b   :  { %s114_s10 = scalar_lea.hbm %s240_s2, 128 }
  0x1c   :  { %p115_p11 = scmp.ne.s32.totalorder %s240_s2, %s114_s10  ;;  %p118_p12 = scmp.lt.u32.totalorder %s114_s10, %s240_s2 }
  0x1e   :  { %p120_p13 = pnand %p118_p12, %p115_p11 }
  0x20   :  { %123 = shalt.err (!%p120_p13)
}
  0x21   :  { %s124_s15 = scalar_lea.vmem %s37_s25, 128  ;;  %p129_p1 = scmp.lt.s32.totalorder %s37_s25, %s37_s25 }
  0x22   :  { %p125_p0 = scmp.ne.s32.totalorder %s37_s25, %s124_s15  ;;  %p130_p2 = scmp.lt.s32.totalorder %s124_s15, %s124_s15 }
  0x24   :  { %p131_p3 = por %p130_p2, %p129_p1 }
  0x26   :  { %p132_p4 = pnand %p131_p3, %p125_p0 }
  0x28   :  { %135 = shalt.err (!%p132_p4)
}
  0x29   :  { %39 = dma.hbm_to_vmem [thread:$0]  %s240_s2, 128, %s37_s25, [#allocation8]  }
  0x2a   :  { %158 = dma.done.wait [#allocation5], 16  }
  0x2b   :  { %159 = vsyncadd [#allocation5], 4294967280 }
  0x2c   :  { %160 = dma.done.wait [#allocation3], 128  }
  0x2d   :  { %161 = vsyncadd [#allocation3], 4294967168 }
  0x2e   :  { %162 = dma.done.wait [#allocation8], 128  }
  0x2f   :  { %163 = vsyncadd [#allocation8], 4294967168 }
  0x30   :  { %49 = sfence }
  0x31   :  { %s50_s17 = sld [smem:[#allocation2]]  ;;  %s77_s18 = sld [smem:[#allocation2 + $0x1]]  ;;  %v52_v0 = vld [vmem:[#allocation6] sm:$0xff]  ;;  %v55_v1 = vld [vmem:[#allocation7] sm:$0xff] }
  0x32   :  { %s169_s19 = smov [#allocation9]  }
  0x33   :  { %s66_s20 = sshll.u32 %s169_s19, 4  ;;  %s67_s20 = int_to_ptr.vmem [resolvable:$true] %s66_s20 }
  0x34   :  { %s136_s2 = scalar_lea.vmem %s67_s20, 128  ;;  %p141_p6 = scmp.lt.s32.totalorder %s67_s20, %s67_s20 }
  0x35   :  { %p137_p5 = scmp.ne.s32.totalorder %s67_s20, %s136_s2  ;;  %p142_p7 = scmp.lt.s32.totalorder %s136_s2, %s136_s2 }
  0x37   :  { %v53_v2 = vstv %s50_s17  ;;  %v56_v3 = vstv %s77_s18  ;;  %p143_p8 = por %p142_p7, %p141_p6 }
  0x38   :  { %v54_v4 = vmul.f32 %v53_v2, %v52_v0  ;;  %v57_v5 = vmul.f32 %v56_v3, %v55_v1 }
  0x39   :  { %p144_p9 = pnand %p143_p8, %p137_p5 }
  0x3a   :  { %v58_v6 = vadd.f32 %v57_v5, %v54_v4 }
  0x3c   :  { %59 = vst [vmem:[#allocation9] sm:$0xff] %v58_v6 }
  0x3d   :  { %147 = shalt.err (!%p144_p9)
}
  0x3e   :  { %s148_s23 = scalar_lea.hbm %s241_s3, 128 }
  0x3f   :  { %p149_p10 = scmp.ne.s32.totalorder %s241_s3, %s148_s23  ;;  %p152_p11 = scmp.lt.u32.totalorder %s148_s23, %s241_s3 }
  0x41   :  { %p154_p12 = pnand %p152_p11, %p149_p10 }
  0x43   :  { %157 = shalt.err (!%p154_p12)
}
  0x44   :  { %69 = dma.vmem_to_hbm [thread:$0]  %s67_s20, 128, %s241_s3, [#allocation4]  }
  0x45   :  { %164 = dma.done.wait [#allocation4], 128  }
  0x46   :  { %165 = vsyncadd [#allocation4], 4294967168 }
  0x47   :  { %73 = vsyncpa [#allocation3], 1 }
  0x48   :  { %74 = vsyncpa [#allocation8], 1 }
  0x49   :  { %75 = vsyncpa [#allocation4], 1 }
  0x4a   :  { %76 = vsyncpa [#allocation5], 1 }

</bundles_post_ra>
